<compile_context>
chip_gen: v7x
topology: tpu7x:2x2x1
jax: 0.10.0
libtpu: 0.0.40
codegen_flags: <defaults>
</compile_context>

<pallas_src>
import jax
import jax.numpy as jnp
from jax import lax
from jax.experimental import pallas as pl
from jax.experimental.pallas import tpu as pltpu


def _round_up(x, m):
    return ((x + m - 1) // m) * m


def mlp_kernel(x_ref,
               w1_ref, b1_ref,
               w2_ref, b2_ref,
               w3_ref, b3_ref,
               w4_ref, b4_ref,
               o_ref):
    """Fused 4-layer MLP forward for one batch tile.

    x_ref : (bt, D)   f32    -- batch on sublanes (as stored in HBM)
    w1    : (64, D)   bf16   -- PyTorch layout [out, in]
    w2    : (32, 64)  bf16
    w3    : (16, 32)  bf16
    w4    : (16, 1)   f32    -- column vector for the sublane reduction
    b1..b3: (out, 1)  f32
    b4    : (1, 1)    f32
    o_ref : (1, bt)   f32    -- lane-dense output (batch on lanes)
    """
    # In-kernel bf16 cast: x never takes an extra HBM pass on the host.
    x = x_ref[...].astype(jnp.bfloat16)                               # (bt, D)

    # Layer 1: contract the shared D axis -> (64, bt); batch lands on lanes.
    h = lax.dot_general(w1_ref[...], x, (((1,), (1,)), ((), ())),
                        preferred_element_type=jnp.float32)
    h = jnp.maximum(h + b1_ref[...], 0.0).astype(jnp.bfloat16)        # (64, bt)

    # Layer 2: (32, 64) @ (64, bt) -> (32, bt)
    h = jnp.dot(w2_ref[...], h, preferred_element_type=jnp.float32)
    h = jnp.maximum(h + b2_ref[...], 0.0).astype(jnp.bfloat16)        # (32, bt)

    # Layer 3: (16, 32) @ (32, bt) -> (16, bt); keep f32 (layer 4 needs no MXU).
    h = jnp.dot(w3_ref[...], h, preferred_element_type=jnp.float32)
    h = jnp.maximum(h + b3_ref[...], 0.0)                             # (16, bt)

    # Layer 4 as a sublane reduction (a K=16, N=1 MXU matmul would waste MXU).
    z = jnp.sum(w4_ref[...] * h, axis=0, keepdims=True) + b4_ref[...]  # (1, bt)

    # Sigmoid: exp and the approximate reciprocal both live on the EUP slot.
    o_ref[...] = pl.reciprocal(1.0 + jnp.exp(-z), approx=True)


def tals_flame_forward(x, params, *, batch_tile=2048):
    """x: [B, input_size] float32. params: PyTorch-layout weights/biases."""
    B, D = x.shape

    # VMEM guard: the f32 x tile is lane-padded to round_up(D, 128) and
    # double-buffered; keep that footprint comfortably under the scoped limit.
    d_pad = _round_up(D, 128)
    bt_cap = max(128, ((8 * 1024 * 1024) // (d_pad * 4 * 2)) // 128 * 128)
    # Keep >= 2 grid steps when B > 128 so v7x can shard the parallel axis
    # across its two TensorCores; single tile for tiny batches.
    bt = min(batch_tile, bt_cap, max(128, _round_up(pl.cdiv(B, 2), 128)))
    num_tiles = pl.cdiv(B, bt)

    # Weight-side plumbing only (tiny, one-time); x goes in untouched.
    w1 = params["w1"].astype(jnp.bfloat16)            # (64, D)
    w2 = params["w2"].astype(jnp.bfloat16)            # (32, 64)
    w3 = params["w3"].astype(jnp.bfloat16)            # (16, 32)
    w4 = params["w4"].reshape(16, 1)                  # (16, 1) f32
    b1 = params["b1"].reshape(-1, 1)                  # (64, 1) f32
    b2 = params["b2"].reshape(-1, 1)                  # (32, 1) f32
    b3 = params["b3"].reshape(-1, 1)                  # (16, 1) f32
    b4 = params["b4"].reshape(1, 1)                   # (1, 1)  f32

    out = pl.pallas_call(
        mlp_kernel,
        out_shape=jax.ShapeDtypeStruct((1, B), jnp.float32),
        grid=(num_tiles,),
        in_specs=[
            pl.BlockSpec((bt, D), lambda i: (i, 0)),          # x tile (partial last block OK)
            pl.BlockSpec(w1.shape, lambda i: (0, 0)),
            pl.BlockSpec(b1.shape, lambda i: (0, 0)),
            pl.BlockSpec(w2.shape, lambda i: (0, 0)),
            pl.BlockSpec(b2.shape, lambda i: (0, 0)),
            pl.BlockSpec(w3.shape, lambda i: (0, 0)),
            pl.BlockSpec(b3.shape, lambda i: (0, 0)),
            pl.BlockSpec(w4.shape, lambda i: (0, 0)),
            pl.BlockSpec(b4.shape, lambda i: (0, 0)),
        ],
        out_specs=pl.BlockSpec((1, bt), lambda i: (0, i)),     # lane-dense output
        compiler_params=pltpu.CompilerParams(
            dimension_semantics=("parallel",)),
    )(x, w1, b1, w2, b2, w3, b3, w4, b4)

    return out[0].reshape(B, 1)


def init_params(key, input_size):
    """Deterministic init, PyTorch nn.Linear layout ([out, in]) and bounds."""
    dims = [(input_size, 64), (64, 32), (32, 16), (16, 1)]
    params = {}
    for idx, (fan_in, fan_out) in enumerate(dims, start=1):
        key, kw, kb = jax.random.split(key, 3)
        bound = fan_in ** -0.5
        params[f"w{idx}"] = jax.random.uniform(
            kw, (fan_out, fan_in), jnp.float32, -bound, bound)
        params[f"b{idx}"] = jax.random.uniform(
            kb, (fan_out,), jnp.float32, -bound, bound)
    return params


def reference_forward(x, params):
    """Pure-JAX reference mirroring the kernel's bf16/f32 numerics."""
    h = x.astype(jnp.bfloat16)
    for idx in (1, 2, 3):
        w = params[f"w{idx}"].astype(jnp.bfloat16)
        h = jnp.dot(h, w.T, preferred_element_type=jnp.float32)
        h = jnp.maximum(h + params[f"b{idx}"][None, :], 0.0)
        if idx < 3:
            h = h.astype(jnp.bfloat16)
    z = jnp.sum(h * params["w4"], axis=-1, keepdims=True) + params["b4"][None, :]
    return 1.0 / (1.0 + jnp.exp(-z))


if __name__ == "__main__":
    key = jax.random.PRNGKey(0)
    batch, input_size = 16, 32

    kx, kp, kx2 = jax.random.split(key, 3)
    params = init_params(kp, input_size)

    # Small demo shape: single (partial) tile, exercises masked output writes.
    x = jax.random.normal(kx, (batch, input_size), jnp.float32)
    y = jax.block_until_ready(tals_flame_forward(x, params))
    y_ref = reference_forward(x, params)
    assert y.shape == (batch, 1)
    # Tolerance covers the EUP approximate reciprocal in the sigmoid.
    assert jnp.allclose(y, y_ref, atol=5e-3, rtol=5e-3), "mismatch vs reference"

    # Larger, non-multiple batch: multi-step parallel grid + partial last block.
    x2 = jax.random.normal(kx2, (1000, input_size), jnp.float32)
    y2 = jax.block_until_ready(tals_flame_forward(x2, params))
    y2_ref = reference_forward(x2, params)
    assert y2.shape == (1000, 1)
    assert jnp.allclose(y2, y2_ref, atol=5e-3, rtol=5e-3), "mismatch (big batch)"

    print("KERNEL_OK")
</pallas_src>

<mosaic_0001>
module attributes {stable_mosaic.version = 11 : i64} {
  func.func @mlp_kernel(%arg0: i32, %arg1: memref<128x32xf32, #tpu.memory_space<vmem>>, %arg2: memref<64x32xbf16, #tpu.memory_space<vmem>>, %arg3: memref<64x1xf32, #tpu.memory_space<vmem>>, %arg4: memref<32x64xbf16, #tpu.memory_space<vmem>>, %arg5: memref<32x1xf32, #tpu.memory_space<vmem>>, %arg6: memref<16x32xbf16, #tpu.memory_space<vmem>>, %arg7: memref<16x1xf32, #tpu.memory_space<vmem>>, %arg8: memref<16x1xf32, #tpu.memory_space<vmem>>, %arg9: memref<1x1xf32, #tpu.memory_space<vmem>>, %arg10: memref<1x128xf32, #tpu.memory_space<vmem>>) attributes {dimension_semantics = [#tpu.dimension_semantics<parallel>], iteration_bounds = array<i64: 1>, scalar_prefetch = 0 : i64, scratch_operands = 0 : i64, tpu.core_type = #tpu.core_type<tc>, window_params = [{transform_indices = @transform_0, window_bounds = array<i64: 128, 32>}, {pipeline_mode = #tpu.pipeline_mode<synchronous>, transform_indices = @transform_1, window_bounds = array<i64: 64, 32>}, {pipeline_mode = #tpu.pipeline_mode<synchronous>, transform_indices = @transform_2, window_bounds = array<i64: 64, 1>}, {pipeline_mode = #tpu.pipeline_mode<synchronous>, transform_indices = @transform_3, window_bounds = array<i64: 32, 64>}, {pipeline_mode = #tpu.pipeline_mode<synchronous>, transform_indices = @transform_4, window_bounds = array<i64: 32, 1>}, {pipeline_mode = #tpu.pipeline_mode<synchronous>, transform_indices = @transform_5, window_bounds = array<i64: 16, 32>}, {pipeline_mode = #tpu.pipeline_mode<synchronous>, transform_indices = @transform_6, window_bounds = array<i64: 16, 1>}, {pipeline_mode = #tpu.pipeline_mode<synchronous>, transform_indices = @transform_7, window_bounds = array<i64: 16, 1>}, {pipeline_mode = #tpu.pipeline_mode<synchronous>, transform_indices = @transform_8, window_bounds = array<i64: 1, 1>}, {transform_indices = @transform_9, window_bounds = array<i64: 1, 128>}]} {
    %c0 = arith.constant 0 : index
    %c0_0 = arith.constant 0 : index
    %0 = vector.load %arg1[%c0, %c0_0] : memref<128x32xf32, #tpu.memory_space<vmem>>, vector<128x32xf32>
    %1 = arith.truncf %0 : vector<128x32xf32> to vector<128x32xbf16>
    %c0_1 = arith.constant 0 : index
    %c0_2 = arith.constant 0 : index
    %2 = vector.load %arg2[%c0_1, %c0_2] : memref<64x32xbf16, #tpu.memory_space<vmem>>, vector<64x32xbf16>
    %cst = arith.constant dense<0.000000e+00> : vector<64x128xf32>
    %3 = tpu.matmul %2, %1, %cst {dimension_numbers = #tpu.dot_dimension_numbers<[1], [1], [0], [0], [0, 0, 1, 0], [], []>} : vector<64x32xbf16>, vector<128x32xbf16>, vector<64x128xf32> -> vector<64x128xf32>
    %c0_3 = arith.constant 0 : index
    %c0_4 = arith.constant 0 : index
    %4 = vector.load %arg3[%c0_3, %c0_4] : memref<64x1xf32, #tpu.memory_space<vmem>>, vector<64x1xf32>
    %5 = vector.broadcast %4 : vector<64x1xf32> to vector<64x128xf32>
    %6 = arith.addf %3, %5 : vector<64x128xf32>
    %cst_5 = arith.constant 0.000000e+00 : f32
    %7 = vector.broadcast %cst_5 : f32 to vector<64x128xf32>
    %8 = arith.maximumf %6, %7 : vector<64x128xf32>
    %9 = arith.truncf %8 : vector<64x128xf32> to vector<64x128xbf16>
    %c0_6 = arith.constant 0 : index
    %c0_7 = arith.constant 0 : index
    %10 = vector.load %arg4[%c0_6, %c0_7] : memref<32x64xbf16, #tpu.memory_space<vmem>>, vector<32x64xbf16>
    %cst_8 = arith.constant dense<0.000000e+00> : vector<32x128xf32>
    %11 = tpu.matmul %10, %9, %cst_8 {dimension_numbers = #tpu.dot_dimension_numbers<[1], [0], [0], [1], [0, 0, 1, 1], [], []>} : vector<32x64xbf16>, vector<64x128xbf16>, vector<32x128xf32> -> vector<32x128xf32>
    %c0_9 = arith.constant 0 : index
    %c0_10 = arith.constant 0 : index
    %12 = vector.load %arg5[%c0_9, %c0_10] : memref<32x1xf32, #tpu.memory_space<vmem>>, vector<32x1xf32>
    %13 = vector.broadcast %12 : vector<32x1xf32> to vector<32x128xf32>
    %14 = arith.addf %11, %13 : vector<32x128xf32>
    %cst_11 = arith.constant 0.000000e+00 : f32
    %15 = vector.broadcast %cst_11 : f32 to vector<32x128xf32>
    %16 = arith.maximumf %14, %15 : vector<32x128xf32>
    %17 = arith.truncf %16 : vector<32x128xf32> to vector<32x128xbf16>
    %c0_12 = arith.constant 0 : index
    %c0_13 = arith.constant 0 : index
    %18 = vector.load %arg6[%c0_12, %c0_13] : memref<16x32xbf16, #tpu.memory_space<vmem>>, vector<16x32xbf16>
    %cst_14 = arith.constant dense<0.000000e+00> : vector<16x128xf32>
    %19 = tpu.matmul %18, %17, %cst_14 {dimension_numbers = #tpu.dot_dimension_numbers<[1], [0], [0], [1], [0, 0, 1, 1], [], []>} : vector<16x32xbf16>, vector<32x128xbf16>, vector<16x128xf32> -> vector<16x128xf32>
    %c0_15 = arith.constant 0 : index
    %c0_16 = arith.constant 0 : index
    %20 = vector.load %arg7[%c0_15, %c0_16] : memref<16x1xf32, #tpu.memory_space<vmem>>, vector<16x1xf32>
    %21 = vector.broadcast %20 : vector<16x1xf32> to vector<16x128xf32>
    %22 = arith.addf %19, %21 : vector<16x128xf32>
    %cst_17 = arith.constant 0.000000e+00 : f32
    %23 = vector.broadcast %cst_17 : f32 to vector<16x128xf32>
    %24 = arith.maximumf %22, %23 : vector<16x128xf32>
    %c0_18 = arith.constant 0 : index
    %c0_19 = arith.constant 0 : index
    %25 = vector.load %arg8[%c0_18, %c0_19] : memref<16x1xf32, #tpu.memory_space<vmem>>, vector<16x1xf32>
    %26 = vector.broadcast %25 : vector<16x1xf32> to vector<16x128xf32>
    %27 = arith.mulf %26, %24 : vector<16x128xf32>
    %cst_20 = arith.constant dense<0.000000e+00> : vector<128xf32>
    %28 = vector.multi_reduction <add>, %27, %cst_20 [0] : vector<16x128xf32> to vector<128xf32>
    %29 = vector.shape_cast %28 : vector<128xf32> to vector<1x128xf32>
    %c0_21 = arith.constant 0 : index
    %c0_22 = arith.constant 0 : index
    %30 = vector.load %arg9[%c0_21, %c0_22] : memref<1x1xf32, #tpu.memory_space<vmem>>, vector<1x1xf32>
    %31 = vector.broadcast %30 : vector<1x1xf32> to vector<1x128xf32>
    %32 = arith.addf %29, %31 : vector<1x128xf32>
    %cst_23 = arith.constant 0.000000e+00 : f32
    %33 = vector.broadcast %cst_23 : f32 to vector<1x128xf32>
    %34 = arith.subf %33, %32 : vector<1x128xf32>
    %35 = math.exp %34 : vector<1x128xf32>
    %cst_24 = arith.constant 1.000000e+00 : f32
    %36 = vector.broadcast %cst_24 : f32 to vector<1x128xf32>
    %37 = arith.addf %36, %35 : vector<1x128xf32>
    %38 = tpu.reciprocal %37 {approx = true} : vector<1x128xf32> -> vector<1x128xf32>
    %c0_25 = arith.constant 0 : index
    %c0_26 = arith.constant 0 : index
    %39 = vector.load %arg10[%c0_25, %c0_26] : memref<1x128xf32, #tpu.memory_space<vmem>>, vector<1x128xf32>
    tpu.vector_store %arg10[%c0_25, %c0_26], %38 {strides = array<i32>} : memref<1x128xf32, #tpu.memory_space<vmem>>, vector<1x128xf32>,
    return
  }
  func.func @transform_0(%arg0: i32) -> (i32, i32) {
    %c0_i32 = arith.constant 0 : i32
    %c0_i32_0 = arith.constant 0 : i32
    return %arg0, %c0_i32 : i32, i32
  }
  func.func @transform_1(%arg0: i32) -> (i32, i32) {
    %c0_i32 = arith.constant 0 : i32
    %c0_i32_0 = arith.constant 0 : i32
    %c0_i32_1 = arith.constant 0 : i32
    return %c0_i32, %c0_i32_0 : i32, i32
  }
  func.func @transform_2(%arg0: i32) -> (i32, i32) {
    %c0_i32 = arith.constant 0 : i32
    %c0_i32_0 = arith.constant 0 : i32
    %c0_i32_1 = arith.constant 0 : i32
    return %c0_i32, %c0_i32_0 : i32, i32
  }
  func.func @transform_3(%arg0: i32) -> (i32, i32) {
    %c0_i32 = arith.constant 0 : i32
    %c0_i32_0 = arith.constant 0 : i32
    %c0_i32_1 = arith.constant 0 : i32
    return %c0_i32, %c0_i32_0 : i32, i32
  }
  func.func @transform_4(%arg0: i32) -> (i32, i32) {
    %c0_i32 = arith.constant 0 : i32
    %c0_i32_0 = arith.constant 0 : i32
    %c0_i32_1 = arith.constant 0 : i32
    return %c0_i32, %c0_i32_0 : i32, i32
  }
  func.func @transform_5(%arg0: i32) -> (i32, i32) {
    %c0_i32 = arith.constant 0 : i32
    %c0_i32_0 = arith.constant 0 : i32
    %c0_i32_1 = arith.constant 0 : i32
    return %c0_i32, %c0_i32_0 : i32, i32
  }
  func.func @transform_6(%arg0: i32) -> (i32, i32) {
    %c0_i32 = arith.constant 0 : i32
    %c0_i32_0 = arith.constant 0 : i32
    %c0_i32_1 = arith.constant 0 : i32
    return %c0_i32, %c0_i32_0 : i32, i32
  }
  func.func @transform_7(%arg0: i32) -> (i32, i32) {
    %c0_i32 = arith.constant 0 : i32
    %c0_i32_0 = arith.constant 0 : i32
    %c0_i32_1 = arith.constant 0 : i32
    return %c0_i32, %c0_i32_0 : i32, i32
  }
  func.func @transform_8(%arg0: i32) -> (i32, i32) {
    %c0_i32 = arith.constant 0 : i32
    %c0_i32_0 = arith.constant 0 : i32
    %c0_i32_1 = arith.constant 0 : i32
    return %c0_i32, %c0_i32_0 : i32, i32
  }
  func.func @transform_9(%arg0: i32) -> (i32, i32) {
    %c0_i32 = arith.constant 0 : i32
    %c0_i32_0 = arith.constant 0 : i32
    return %c0_i32, %arg0 : i32, i32
  }
}

</mosaic_0001>

<bundles_post_ra>
// kernel: tpu_custom_call.1
= control target key start
LH: loop header
LB: loop body
LE: loop exit
PB: predicated region body
PF: predicated region fallthrough
CT: control target
= control target key end

     0   :  { %s804_s0 = inlined_call_operand.vmem [shape: f32[16,32], index: 0, kind: input, shape index: {}]   ;;  %s805_s1 = inlined_call_operand.vmem [shape: bf16[64,32], index: 1, kind: input, shape index: {}]   ;;  %s806_s2 = inlined_call_operand.vmem [shape: f32[64,1], index: 2, kind: input, shape index: {}]   ;;  %s807_s3 = inlined_call_operand.vmem [shape: bf16[32,64], index: 3, kind: input, shape index: {}]   ;;  %s808_s4 = inlined_call_operand.vmem [shape: f32[32,1], index: 4, kind: input, shape index: {}]   ;;  %s809_s5 = inlined_call_operand.vmem [shape: bf16[16,32], index: 5, kind: input, shape index: {}]   ;;  %s810_s6 = inlined_call_operand.vmem [shape: f32[16,1], index: 6, kind: input, shape index: {}]   ;;  %s811_s7 = inlined_call_operand.vmem [shape: f32[16,1], index: 7, kind: input, shape index: {}]   ;;  %s812_s8 = inlined_call_operand.<no memory space> [shape: f32[1,1], index: 8, kind: input, shape index: {}]   ;;  %s813_s9 = inlined_call_operand.hbm [shape: f32[1,16], index: 9, kind: output, shape index: {}]  }
   0x1   :  { %v14_v0 = vstv %s812_s8 }
   0x2   :  { %15 = vst [vmem:[#allocation2] sm:$0x1] %v14_v0 }
   0x3   :  { %v36_v1 = vld [vmem:[%s804_s0] sm:$0xff]  ;;  %v37_v2 = vld [vmem:[%s804_s0 + $0x8] sm:$0xff]  ;;  %vm136_vm0 = vcmask 261120   ;;  %v38_v3 = vld [vmem:[%s804_s0 + $0x10] sm:$0xff]  ;;  %v595_v6 = vmov 0  }
   0x4   :  { %v52_v4 = vpack.c.bf16 %v37_v2, %v36_v1  ;;  %v39_v5 = vld [vmem:[%s804_s0 + $0x18] sm:$0xff]  ;;  %558 = vset.pattern.permute.xlu0 %v595_v6  ;;  %559 = vset.pattern.permute.xlu1 %v595_v6  ;;  %v40_v9 = vld [vmem:[%s804_s0 + $0x20] sm:$0xff]  ;;  %v41_v10 = vld [vmem:[%s804_s0 + $0x28] sm:$0xff] }
   0x5   :  { %v53_v7 = vpack.c.bf16 %v39_v5, %v38_v3  ;;  %v560_v11 = vld [vmem:[%s805_s1] sm:$0xff]   ;;  %v54_v13 = vpack.c.bf16 %v41_v10, %v40_v9  ;;  %v70_v15 = vld [vmem:[%s806_s2 + $0x10] sm:$0xff]  ;;  %v69_v16 = vld [vmem:[%s806_s2 + $0x8] sm:$0xff] }
   0x6   :  { %546 = vmatprep.subr.msk.bf16.mxu0 %vm136_vm0, %v52_v4  ;;  %v150_v8 = vsel %vm136_vm0, %v52_v4, 0  ;;  %518 = vmatprep.mubr.msk.bf16.mxu0 %vm136_vm0, %v560_v11  ;;  %v68_v14 = vld [vmem:[%s806_s2] sm:$0xff]  ;;  %v71_v17 = vld [vmem:[%s806_s2 + $0x18] sm:$0xff]  ;;  %v42_v18 = vld [vmem:[%s804_s0 + $0x30] sm:$0xff] }
   0x7   :  { %503 = vmatpush3.bf16.xpose.msra.mxu0 %v150_v8  ;;  %v153_v12 = vsel %vm136_vm0, %v53_v7, 0  ;;  %78 = vperm.xlu0 %558, %v68_v14   ;;  %v43_v19 = vld [vmem:[%s804_s0 + $0x38] sm:$0xff]  ;;  %v72_v20 = vld [vmem:[%s806_s2 + $0x20] sm:$0xff]  ;;  %v73_v21 = vld [vmem:[%s806_s2 + $0x28] sm:$0xff]  ;;  %v156_v22 = vsel %vm136_vm0, %v54_v13, 0 }
   0x8   :  { %547 = vmatprep.subr.msk.bf16.mxu0 %vm136_vm0, %v53_v7  ;;  %88 = vperm.xlu1 %559, %v70_v15   ;;  %v55_v23 = vpack.c.bf16 %v43_v19, %v42_v18 }
   0xb   :  { %83 = vperm.xlu0 %558, %v69_v16  }
   0xc   :  { %93 = vperm.xlu1 %559, %v71_v17  }
   0xf   :  { %505 = vmatpush3.bf16.xpose.msra.mxu0 %v153_v12 }
  0x10   :  { %548 = vmatprep.subr.msk.bf16.mxu0 %vm136_vm0, %v54_v13 }
  0x11   :  { %16 = vsyncpa [#allocation4], 0  ;;  %98 = vperm.xlu0 %558, %v72_v20   ;;  %v74_v24 = vld [vmem:[%s806_s2 + $0x30] sm:$0xff]  ;;  %103 = vperm.xlu1 %559, %v73_v21   ;;  %v75_v25 = vld [vmem:[%s806_s2 + $0x38] sm:$0xff]  ;;  %v159_v30 = vsel %vm136_vm0, %v55_v23, 0  ;;  %vm288_vm1 = vcmask 523264  }
  0x12   :  { %v44_v26 = vld [vmem:[%s804_s0 + $0x40] sm:$0xff]  ;;  %v45_v27 = vld [vmem:[%s804_s0 + $0x48] sm:$0xff]  ;;  %v256_v32 = vld [vmem:[%s808_s4 + $0x10] sm:$0xff]  ;;  %vm597_vm2 = vmmov 0  }
  0x13   :  { %v254_v28 = vld [vmem:[%s808_s4] sm:$0xff]  ;;  %v255_v29 = vld [vmem:[%s808_s4 + $0x8] sm:$0xff]  ;;  %v56_v31 = vpack.c.bf16 %v45_v27, %v44_v26  ;;  %v257_v33 = vld [vmem:[%s808_s4 + $0x18] sm:$0xff] }
  0x14   :  { %v46_v34 = vld [vmem:[%s804_s0 + $0x50] sm:$0xff]  ;;  %v47_v35 = vld [vmem:[%s804_s0 + $0x58] sm:$0xff]  ;;  %v352_v36 = vld [vmem:[%s810_s6] sm:$0xff] }
  0x15   :  { %108 = vperm.xlu0 %558, %v74_v24   ;;  %113 = vperm.xlu1 %559, %v75_v25   ;;  %v353_v37 = vld [vmem:[%s810_s6 + $0x8] sm:$0xff]  ;;  %v162_v38 = vsel %vm136_vm0, %v56_v31, 0  ;;  %v57_v39 = vpack.c.bf16 %v47_v35, %v46_v34  ;;  %v415_v40 = vld [vmem:[%s811_s7] sm:$0xff]  ;;  %v50_v47 = vld [vmem:[%s804_s0 + $0x70] sm:$0xff] }
  0x16   :  { %v416_v41 = vld [vmem:[%s811_s7 + $0x8] sm:$0xff]  ;;  %v48_v42 = vld [vmem:[%s804_s0 + $0x60] sm:$0xff]  ;;  %v51_v48 = vld [vmem:[%s804_s0 + $0x78] sm:$0xff] }
  0x17   :  { %507 = vmatpush3.bf16.xpose.msra.mxu0 %v156_v22  ;;  %v49_v43 = vld [vmem:[%s804_s0 + $0x68] sm:$0xff]  ;;  %v436_v44 = vld [vmem:[#allocation2] sm:$0x1]  ;;  %v165_v45 = vsel %vm136_vm0, %v57_v39, 0  ;;  %v59_v50 = vpack.c.bf16 %v51_v48, %v50_v47  ;;  %v562_v53 = vld [vmem:[%s805_s1 + $0x10] sm:$0xff]  }
  0x18   :  { %549 = vmatprep.subr.msk.bf16.mxu0 %vm136_vm0, %v55_v23  ;;  %v58_v46 = vpack.c.bf16 %v49_v43, %v48_v42  ;;  %v561_v52 = vld [vmem:[%s805_s1 + $0x8] sm:$0xff]   ;;  %v563_v54 = vld [vmem:[%s805_s1 + $0x18] sm:$0xff]   ;;  %v564_v55 = vld [vmem:[%s807_s3] sm:$0xff]  }
  0x19   :  { %260 = vperm.xlu0 %558, %v254_v28   ;;  %265 = vperm.xlu1 %559, %v255_v29   ;;  %v171_v51 = vsel %vm136_vm0, %v59_v50, 0  ;;  %v565_v28 = vld [vmem:[%s807_s3 + $0x8] sm:$0xff]   ;;  %v596_v29 = vmov 0.0   ;;  %v566_v48 = vld [vmem:[%s809_s5] sm:$0xff]   ;;  %s598_s5 = smov [#allocation3]  }
  0x1a   :  { %v168_v49 = vsel %vm136_vm0, %v58_v46, 0  ;;  %534 = vmatprep.mubr.msk.bf16.mxu1 %vm288_vm1, %v564_v55  ;;  %s459_s15 = sshll.u32 %s598_s5, 4  ;;  %s460_s15 = int_to_ptr.vmem [resolvable:$true] %s459_s15 }
  0x1b   :  { %s571_s16 = scalar_lea.vmem %s460_s15, 16  ;;  %s575_s17 = scalar_lea.vmem %s460_s15, 32 }
  0x1c   :  { %p572_p0 = scmp.ne.s32.totalorder %s460_s15, %s571_s16  ;;  %p576_p1 = scmp.lt.s32.totalorder %s460_s15, %s460_s15 }
  0x1d   :  { %270 = vperm.xlu0 %558, %v256_v32   ;;  %275 = vperm.xlu1 %559, %v257_v33   ;;  %p577_p2 = scmp.lt.s32.totalorder %s575_s17, %s571_s16 }
  0x1f   :  { %509 = vmatpush3.bf16.xpose.msra.mxu0 %v159_v30  ;;  %p578_p3 = por %p577_p2, %p576_p1 }
  0x20   :  { %550 = vmatprep.subr.msk.bf16.mxu0 %vm136_vm0, %v56_v31 }
  0x21   :  { %356 = vperm.xlu0 %558, %v352_v36   ;;  %361 = vperm.xlu1 %559, %v353_v37   ;;  %p579_p4 = pnand %p578_p3, %p572_p0 }
  0x25   :  { %419 = vperm.xlu0 %558, %v415_v40   ;;  %424 = vperm.xlu1 %559, %v416_v41  }
  0x27   :  { %511 = vmatpush3.bf16.xpose.msra.mxu0 %v162_v38 }
  0x28   :  { %551 = vmatprep.subr.msk.bf16.mxu0 %vm136_vm0, %v57_v39 }
  0x29   :  { %439 = vperm.xlu0 %558, %v436_v44  }
  0x2f   :  { %513 = vmatpush3.bf16.xpose.msra.mxu0 %v165_v45 }
  0x30   :  { %552 = vmatprep.subr.msk.bf16.mxu0 %vm136_vm0, %v58_v46 }
  0x37   :  { %515 = vmatpush3.bf16.xpose.msra.mxu0 %v168_v49 }
  0x38   :  { %553 = vmatprep.subr.msk.bf16.mxu0 %vm136_vm0, %v59_v50 }
  0x3f   :  { %517 = vmatpush3.bf16.xpose.msra.mxu0 %v171_v51 }
  0x46   :  { %519 = vmatmul.mubr.msk.bf16.vlgmr.msra.gmra.mrb[0].mxu0 %vm136_vm0, %v561_v52 }
  0x47   :  { %522 = vmatprep.mubr.msk.bf16.mxu0 %vm136_vm0, %v562_v53 }
  0x4e   :  { %523 = vmatmul.mubr.msk.bf16.gmra.mrb[4].mxu0 %vm136_vm0, %v563_v54 }
  0x86   :  { %v79_v56 = vpop.permute.xlu0 %78 }
  0x87   :  { %v89_v57 = vpop.permute.xlu1 %88 }
  0x8a   :  { %v84_v58 = vpop.permute.xlu0 %83 }
  0x8b   :  { %v94_v59 = vpop.permute.xlu1 %93 }
  0x90   :  { %v99_v63 = vpop.permute.xlu0 %98  ;;  %v104_v4 = vpop.permute.xlu1 %103 }
  0x94   :  { %v109_v11 = vpop.permute.xlu0 %108  ;;  %v114_v16 = vpop.permute.xlu1 %113 }
  0x98   :  { %v261_v30 = vpop.permute.xlu0 %260  ;;  %v266_v31 = vpop.permute.xlu1 %265 }
  0x9c   :  { %v271_v32 = vpop.permute.xlu0 %270  ;;  %v276_v36 = vpop.permute.xlu1 %275 }
  0xa0   :  { %v357_v49 = vpop.permute.xlu0 %356  ;;  %v362_v50 = vpop.permute.xlu1 %361 }
 0x119   :  { %v520_v60 = vpop.f32.mrb[0].mxu0 }
 0x11a   :  { %v216_v61 = vadd.f32 %v520_v60, %v89_v57  ;;  %v207_v62 = vpop.f32.mrb[1].mxu0  ;;  %v425_v60 = vpop.permute.xlu1 %424 }
 0x11b   :  { %v208_v0 = vadd.f32 %v207_v62, %v79_v56  ;;  %v521_v1 = vpop.f32.mrb[2].mxu0 }
 0x11c   :  { %v219_v2 = vadd.f32 %v521_v1, %v94_v59  ;;  %v210_v3 = vpop.f32.mrb[3].mxu0  ;;  %v240_v6 = vmax.f32 %v216_v61, 0.0  ;;  %v420_v59 = vpop.permute.xlu0 %419 }
 0x11d   :  { %v211_v5 = vadd.f32 %v210_v3, %v84_v58  ;;  %v238_v8 = vmax.f32 %v208_v0, 0.0 }
 0x11e   :  { %v241_v7 = vmax.f32 %v219_v2, 0.0 }
 0x11f   :  { %v239_v9 = vmax.f32 %v211_v5, 0.0 }
 0x120   :  { %v247_v10 = vpack.c.bf16 %v241_v7, %v240_v6  ;;  %v440_v7 = vpop.permute.xlu0 %439 }
 0x121   :  { %v524_v12 = vpop.f32.mrb[4].mxu0  ;;  %v246_v13 = vpack.c.bf16 %v239_v9, %v238_v8 }
 0x122   :  { %v232_v14 = vadd.f32 %v524_v12, %v109_v11  ;;  %v223_v15 = vpop.f32.mrb[5].mxu0 }
 0x123   :  { %v224_v17 = vadd.f32 %v223_v15, %v99_v63  ;;  %v525_v18 = vpop.f32.mrb[6].mxu0  ;;  %526 = vmatprep.subr.bf16.mxu1 %v246_v13  ;;  %v442_v63 = vlaneseq }
 0x124   :  { %v235_v19 = vadd.f32 %v525_v18, %v114_v16  ;;  %v226_v20 = vpop.f32.mrb[7].mxu0  ;;  %527 = vmatpush3.bf16.msra.mxu1 %v246_v13  ;;  %v244_v22 = vmax.f32 %v232_v14, 0.0 }
 0x125   :  { %v227_v21 = vadd.f32 %v226_v20, %v104_v4  ;;  %528 = vmatprep.subr.bf16.mxu1 %v247_v10  ;;  %v242_v24 = vmax.f32 %v224_v17, 0.0  ;;  %v443_v2 = vshrl.u32 %v442_v63, 7 }
 0x126   :  { %v245_v23 = vmax.f32 %v235_v19, 0.0 }
 0x127   :  { %v243_v25 = vmax.f32 %v227_v21, 0.0  ;;  %v444_v5 = vsub.s32 0, %v443_v2 }
 0x128   :  { %v249_v26 = vpack.c.bf16 %v245_v23, %v244_v22  ;;  %529 = vmatpush3.bf16.msra.mxu1 %v247_v10 }
 0x129   :  { %v248_v27 = vpack.c.bf16 %v243_v25, %v242_v24  ;;  %v445_v9 = vrot.slane %v440_v7, %v444_v5 }
 0x12b   :  { %530 = vmatprep.subr.bf16.mxu1 %v248_v27 }
 0x12c   :  { %531 = vmatpush3.bf16.msra.mxu1 %v248_v27 }
 0x12d   :  { %532 = vmatprep.subr.bf16.mxu1 %v249_v26 }
 0x130   :  { %533 = vmatpush3.bf16.msra.mxu1 %v249_v26 }
 0x131   :  { %538 = vmatprep.subr.bf16.mxu1 %v596_v29 }
 0x133   :  { %535 = vmatmul.mubr.msk.bf16.vlgmr.msra.gmra.mrb[0].mxu1 %vm288_vm1, %v565_v28 }
 0x134   :  { %542 = vmatprep.mubr.msk.bf16.mxu1 %vm597_vm2, %v596_v29 }
 0x206   :  { %v536_v33 = vpop.f32.mrb[0].mxu1 }
 0x207   :  { %v338_v34 = vadd.f32 %v536_v33, %v271_v32  ;;  %v329_v35 = vpop.f32.mrb[1].mxu1 }
 0x208   :  { %v330_v37 = vadd.f32 %v329_v35, %v261_v30  ;;  %v537_v38 = vpop.f32.mrb[2].mxu1 }
 0x209   :  { %v341_v39 = vadd.f32 %v537_v38, %v276_v36  ;;  %v332_v40 = vpop.f32.mrb[3].mxu1  ;;  %v346_v42 = vmax.f32 %v338_v34, 0.0 }
 0x20a   :  { %v333_v41 = vadd.f32 %v332_v40, %v266_v31  ;;  %v344_v44 = vmax.f32 %v330_v37, 0.0 }
 0x20b   :  { %v347_v43 = vmax.f32 %v341_v39, 0.0 }
 0x20c   :  { %v345_v45 = vmax.f32 %v333_v41, 0.0 }
 0x20d   :  { %v349_v46 = vpack.c.bf16 %v347_v43, %v346_v42 }
 0x20e   :  { %v348_v47 = vpack.c.bf16 %v345_v45, %v344_v44 }
 0x210   :  { %539 = vmatpush3.bf16.msra.mxu1 %v348_v47 }
 0x211   :  { %540 = vmatprep.subr.bf16.mxu1 %v596_v29 }
 0x214   :  { %541 = vmatpush3.bf16.msra.mxu1 %v349_v46 }
 0x217   :  { %543 = vmatmul.mubr.msk.bf16.vlgmr.msra.gmra.mrb[4].mxu1 %vm136_vm0, %v566_v48 }
 0x2ea   :  { %v406_v51 = vpop.f32.mrb[4].mxu1 }
 0x2eb   :  { %v407_v52 = vadd.f32 %v406_v51, %v357_v49  ;;  %v544_v53 = vpop.f32.mrb[5].mxu1 }
 0x2ec   :  { %v409_v54 = vpop.f32.mrb[6].mxu1 }
 0x2ed   :  { %v413_v55 = vmax.f32 %v407_v52, 0.0  ;;  %v410_v56 = vadd.f32 %v409_v54, %v362_v50  ;;  %v545_v57 = vpop.f32.mrb[7].mxu1 }
 0x2ef   :  { %v414_v58 = vmax.f32 %v410_v56, 0.0  ;;  %v427_v61 = vmul.f32 %v420_v59, %v413_v55 }
 0x2f1   :  { %v428_v62 = vmul.f32 %v425_v60, %v414_v58 }
 0x2f3   :  { %v429_v0 = vadd.f32 %v428_v62, %v427_v61 }
 0x2f5   :  { %v430_v1 = vrot.slane %v429_v0, 4 }
 0x2f7   :  { %v431_v3 = vadd.f32 %v430_v1, %v429_v0 }
 0x2f9   :  { %v432_v4 = vrot.slane %v431_v3, 2 }
 0x2fb   :  { %v433_v6 = vadd.f32 %v432_v4, %v431_v3 }
 0x2fd   :  { %v434_v8 = vrot.slane %v433_v6, 1 }
 0x2ff   :  { %v435_v10 = vadd.f32 %v434_v8, %v433_v6 }
 0x301   :  { %v446_v11 = vadd.f32 %v445_v9, %v435_v10 }
 0x303   :  { %v447_v12 = vsub.f32 0.0, %v446_v11 }
 0x305   :  { %v448_v13 = vmul.f32 1.442695, %v447_v12 }
 0x307   :  { %567 = vpow2.f32 %v448_v13 }
 0x311   :  { %v568_v14 = vpop.eup %567 }
 0x312   :  { %v450_v15 = vadd.f32 1.0, %v568_v14 }
 0x314   :  { %569 = vrcp.f32 %v450_v15 }
 0x31e   :  { %v570_v16 = vpop.eup %569 }
 0x31f   :  { %452 = vst [vmem:[#allocation3] sm:$0x1] %v570_v16 }
 0x320   :  { %582 = shalt.err (!%p579_p4)
}
 0x321   :  { %s583_s4 = scalar_lea.hbm %s813_s9, 16 }
 0x322   :  { %p584_p5 = scmp.ne.s32.totalorder %s813_s9, %s583_s4  ;;  %p587_p6 = scmp.lt.u32.totalorder %s583_s4, %s813_s9 }
 0x324   :  { %p589_p7 = pnand %p587_p6, %p584_p5 }
 0x326   :  { %592 = shalt.err (!%p589_p7)
}
 0x327   :  { %462 = dma.vmem_to_hbm [thread:$0]  %s460_s15, 16, %s813_s9, [#allocation4]  }
 0x328   :  { %593 = dma.done.wait [#allocation4], 16  }
 0x329   :  { %594 = vsyncadd [#allocation4], 4294967280 }
 0x32a   :  { %466 = vsyncpa [#allocation4], 1 }

</bundles_post_ra>
